<compile_context>
chip_gen: v6e
topology: v6e:2x2x1
jax: 0.10.0
libtpu: 0.0.40
codegen_flags: <defaults>
</compile_context>

<pallas_src>
import functools

import jax
import jax.numpy as jnp
from jax.experimental import pallas as pl
from jax.experimental.pallas import tpu as pltpu

SUBLANE_BF16 = 16  # bf16 packs 16 rows per sublane group


def _round_up(n, m):
    return ((n + m - 1) // m) * m


def _cdiv(a, b):
    return (a + b - 1) // b


def mlp_kernel(x_ref, w1_ref, b1_ref, w2_ref, b2_ref, w3_ref, b3_ref, o_ref):
    # Cast the x tile to bf16 in-kernel (VPU); HBM read stays in native dtype.
    x = x_ref[...].astype(jnp.bfloat16)

    # Layer 1: Linear + ReLU (bf16 MXU operands, f32 accumulation, f32 epilogue).
    h = jnp.dot(x, w1_ref[...], preferred_element_type=jnp.float32)
    h = jnp.maximum(h + b1_ref[...], 0.0)

    # Layer 2: Linear + ReLU.
    h = jnp.dot(h.astype(jnp.bfloat16), w2_ref[...],
                preferred_element_type=jnp.float32)
    h = jnp.maximum(h + b2_ref[...], 0.0)

    # Output layer: Linear (no activation).
    y = jnp.dot(h.astype(jnp.bfloat16), w3_ref[...],
                preferred_element_type=jnp.float32)
    o_ref[...] = (y + b3_ref[...]).astype(o_ref.dtype)


def prepare_params(params):
    """One-time param prep (hoist out of the per-step hot path)."""
    w1, b1, w2, b2, w3, b3 = params
    return (w1.astype(jnp.bfloat16), b1.astype(jnp.float32).reshape(1, -1),
            w2.astype(jnp.bfloat16), b2.astype(jnp.float32).reshape(1, -1),
            w3.astype(jnp.bfloat16), b3.astype(jnp.float32).reshape(1, -1))


def _choose_tile_b(B, tile_b_max):
    """Pick TILE_B: 16-row aligned, minimal zero-row padding, >=2 grid steps
    when there is enough work (so both v7x TensorCores get shards)."""
    b16 = _round_up(B, SUBLANE_BF16)
    n_steps = _cdiv(b16, tile_b_max)
    if b16 >= 2 * SUBLANE_BF16:
        n_steps = max(n_steps, 2)
    return _round_up(_cdiv(b16, n_steps), SUBLANE_BF16)


def _vmem_limit_bytes(tile_b, in_f, h1, h2, out_f, x_itemsize, out_itemsize):
    """Derive the scoped-VMEM budget from the actual tile footprint."""
    x_tile = tile_b * in_f * x_itemsize
    out_tile = tile_b * out_f * out_itemsize
    weights = (in_f * h1 + h1 * h2 + h2 * out_f) * 2 + (h1 + h2 + out_f) * 4
    inter = 2 * tile_b * max(h1, h2) * 4  # f32 hidden activations
    need = 2 * (x_tile + out_tile + weights) + inter  # double-buffered in/out
    return int(min(max(2 * need, 8 * 1024 * 1024), 48 * 1024 * 1024))


def simple_context_mlp(x, prepared_params, context=None, tile_b=4096):
    """Pallas implementation of SimpleContextMLP.forward (context ignored)."""
    del context
    w1, b1, w2, b2, w3, b3 = prepared_params
    B, in_features = x.shape
    h1 = w1.shape[1]
    h2 = w2.shape[1]
    out_features = w3.shape[1]
    out_dtype = x.dtype

    TILE_B = _choose_tile_b(B, tile_b)
    B_pad = TILE_B * _cdiv(B, TILE_B)
    if B_pad != B:
        # Only the ragged tail tile needs zero rows; padding is at most TILE_B-1
        # rows thanks to _choose_tile_b.
        x = jnp.pad(x, ((0, B_pad - B), (0, 0)))

    grid = (B_pad // TILE_B,)
    const = lambda shape: pl.BlockSpec(shape, lambda i: (0, 0))

    flops = 2 * B_pad * (in_features * h1 + h1 * h2 + h2 * out_features)
    bytes_accessed = (
        B_pad * in_features * x.dtype.itemsize
        + (w1.size + w2.size + w3.size) * 2
        + (b1.size + b2.size + b3.size) * 4
        + B_pad * out_features * jnp.dtype(out_dtype).itemsize
    )

    out = pl.pallas_call(
        mlp_kernel,
        out_shape=jax.ShapeDtypeStruct((B_pad, out_features), out_dtype),
        grid_spec=pl.GridSpec(
            grid=grid,
            in_specs=[
                pl.BlockSpec((TILE_B, in_features), lambda i: (i, 0)),
                const(w1.shape), const(b1.shape),
                const(w2.shape), const(b2.shape),
                const(w3.shape), const(b3.shape),
            ],
            out_specs=pl.BlockSpec((TILE_B, out_features), lambda i: (i, 0)),
        ),
        compiler_params=pltpu.CompilerParams(
            dimension_semantics=("parallel",),
            vmem_limit_bytes=_vmem_limit_bytes(
                TILE_B, in_features, h1, h2, out_features,
                x.dtype.itemsize, jnp.dtype(out_dtype).itemsize),
        ),
        cost_estimate=pl.CostEstimate(
            flops=flops, transcendentals=0, bytes_accessed=bytes_accessed),
    )(x, w1, b1, w2, b2, w3, b3)

    return out[:B, :]  # drop batch padding; no lane padding to strip


def init_params(key, in_features, hidden_sizes, out_features, dtype=jnp.float32):
    """PyTorch-style uniform(-1/sqrt(fan_in), 1/sqrt(fan_in)) init."""
    sizes = [in_features] + list(hidden_sizes) + [out_features]
    params = []
    for i in range(len(sizes) - 1):
        fan_in, fan_out = sizes[i], sizes[i + 1]
        key, kw, kb = jax.random.split(key, 3)
        bound = 1.0 / jnp.sqrt(jnp.float32(fan_in))
        # stored as [fan_in, fan_out] (transpose of torch nn.Linear weight)
        w = jax.random.uniform(kw, (fan_in, fan_out), dtype, -bound, bound)
        b = jax.random.uniform(kb, (1, fan_out), dtype, -bound, bound)
        params += [w, b]
    return tuple(params)


def reference_mlp(x, params):
    w1, b1, w2, b2, w3, b3 = params
    h = jnp.maximum(x @ w1 + b1, 0.0)
    h = jnp.maximum(h @ w2 + b2, 0.0)
    return h @ w3 + b3


if __name__ == "__main__":
    key = jax.random.PRNGKey(0)
    kx, kp = jax.random.split(key)

    batch = 8
    in_features = 32
    hidden_sizes = [128, 128]
    out_features = 16

    x = jax.random.normal(kx, (batch, in_features), jnp.float32)
    params = init_params(kp, in_features, hidden_sizes, out_features)

    prepared = prepare_params(params)             # one-time weight prep (hoisted)
    forward = jax.jit(functools.partial(simple_context_mlp, tile_b=4096))

    out = forward(x, prepared)
    out = jax.block_until_ready(out)

    ref = reference_mlp(x, params)
    assert out.shape == (batch, out_features)
    # bf16 MXU operands with f32 accumulation -> looser tolerance vs f32 ref.
    assert jnp.allclose(out, ref, atol=5e-2, rtol=5e-2), "mismatch vs reference"

    print("KERNEL_OK")
</pallas_src>

<mosaic_0001>
module attributes {stable_mosaic.version = 11 : i64} {
  func.func @mlp_kernel(%arg0: i32, %arg1: memref<16x32xf32, #tpu.memory_space<vmem>>, %arg2: memref<32x128xbf16, #tpu.memory_space<vmem>>, %arg3: memref<1x128xf32, #tpu.memory_space<vmem>>, %arg4: memref<128x128xbf16, #tpu.memory_space<vmem>>, %arg5: memref<1x128xf32, #tpu.memory_space<vmem>>, %arg6: memref<128x16xbf16, #tpu.memory_space<vmem>>, %arg7: memref<1x16xf32, #tpu.memory_space<vmem>>, %arg8: memref<16x16xf32, #tpu.memory_space<vmem>>) attributes {dimension_semantics = [#tpu.dimension_semantics<parallel>], iteration_bounds = array<i64: 1>, scalar_prefetch = 0 : i64, scratch_operands = 0 : i64, tpu.core_type = #tpu.core_type<tc>, window_params = [{transform_indices = @transform_0, window_bounds = array<i64: 16, 32>}, {pipeline_mode = #tpu.pipeline_mode<synchronous>, transform_indices = @transform_1, window_bounds = array<i64: 32, 128>}, {pipeline_mode = #tpu.pipeline_mode<synchronous>, transform_indices = @transform_2, window_bounds = array<i64: 1, 128>}, {pipeline_mode = #tpu.pipeline_mode<synchronous>, transform_indices = @transform_3, window_bounds = array<i64: 128, 128>}, {pipeline_mode = #tpu.pipeline_mode<synchronous>, transform_indices = @transform_4, window_bounds = array<i64: 1, 128>}, {pipeline_mode = #tpu.pipeline_mode<synchronous>, transform_indices = @transform_5, window_bounds = array<i64: 128, 16>}, {pipeline_mode = #tpu.pipeline_mode<synchronous>, transform_indices = @transform_6, window_bounds = array<i64: 1, 16>}, {transform_indices = @transform_7, window_bounds = array<i64: 16, 16>}]} {
    %c0 = arith.constant 0 : index
    %c0_0 = arith.constant 0 : index
    %0 = vector.load %arg1[%c0, %c0_0] : memref<16x32xf32, #tpu.memory_space<vmem>>, vector<16x32xf32>
    %1 = arith.truncf %0 : vector<16x32xf32> to vector<16x32xbf16>
    %c0_1 = arith.constant 0 : index
    %c0_2 = arith.constant 0 : index
    %2 = vector.load %arg2[%c0_1, %c0_2] : memref<32x128xbf16, #tpu.memory_space<vmem>>, vector<32x128xbf16>
    %cst = arith.constant dense<0.000000e+00> : vector<16x128xf32>
    %3 = tpu.matmul %1, %2, %cst {dimension_numbers = #tpu.dot_dimension_numbers<[1], [0], [0], [1], [0, 0, 1, 1], [], []>} : vector<16x32xbf16>, vector<32x128xbf16>, vector<16x128xf32> -> vector<16x128xf32>
    %c0_3 = arith.constant 0 : index
    %c0_4 = arith.constant 0 : index
    %4 = vector.load %arg3[%c0_3, %c0_4] : memref<1x128xf32, #tpu.memory_space<vmem>>, vector<1x128xf32>
    %5 = vector.broadcast %4 : vector<1x128xf32> to vector<16x128xf32>
    %6 = arith.addf %3, %5 : vector<16x128xf32>
    %cst_5 = arith.constant 0.000000e+00 : f32
    %7 = vector.broadcast %cst_5 : f32 to vector<16x128xf32>
    %8 = arith.maximumf %6, %7 : vector<16x128xf32>
    %9 = arith.truncf %8 : vector<16x128xf32> to vector<16x128xbf16>
    %c0_6 = arith.constant 0 : index
    %c0_7 = arith.constant 0 : index
    %10 = vector.load %arg4[%c0_6, %c0_7] : memref<128x128xbf16, #tpu.memory_space<vmem>>, vector<128x128xbf16>
    %cst_8 = arith.constant dense<0.000000e+00> : vector<16x128xf32>
    %11 = tpu.matmul %9, %10, %cst_8 {dimension_numbers = #tpu.dot_dimension_numbers<[1], [0], [0], [1], [0, 0, 1, 1], [], []>} : vector<16x128xbf16>, vector<128x128xbf16>, vector<16x128xf32> -> vector<16x128xf32>
    %c0_9 = arith.constant 0 : index
    %c0_10 = arith.constant 0 : index
    %12 = vector.load %arg5[%c0_9, %c0_10] : memref<1x128xf32, #tpu.memory_space<vmem>>, vector<1x128xf32>
    %13 = vector.broadcast %12 : vector<1x128xf32> to vector<16x128xf32>
    %14 = arith.addf %11, %13 : vector<16x128xf32>
    %cst_11 = arith.constant 0.000000e+00 : f32
    %15 = vector.broadcast %cst_11 : f32 to vector<16x128xf32>
    %16 = arith.maximumf %14, %15 : vector<16x128xf32>
    %17 = arith.truncf %16 : vector<16x128xf32> to vector<16x128xbf16>
    %c0_12 = arith.constant 0 : index
    %c0_13 = arith.constant 0 : index
    %18 = vector.load %arg6[%c0_12, %c0_13] : memref<128x16xbf16, #tpu.memory_space<vmem>>, vector<128x16xbf16>
    %cst_14 = arith.constant dense<0.000000e+00> : vector<16x16xf32>
    %19 = tpu.matmul %17, %18, %cst_14 {dimension_numbers = #tpu.dot_dimension_numbers<[1], [0], [0], [1], [0, 0, 1, 1], [], []>} : vector<16x128xbf16>, vector<128x16xbf16>, vector<16x16xf32> -> vector<16x16xf32>
    %c0_15 = arith.constant 0 : index
    %c0_16 = arith.constant 0 : index
    %20 = vector.load %arg7[%c0_15, %c0_16] : memref<1x16xf32, #tpu.memory_space<vmem>>, vector<1x16xf32>
    %21 = vector.broadcast %20 : vector<1x16xf32> to vector<16x16xf32>
    %22 = arith.addf %19, %21 : vector<16x16xf32>
    %c0_17 = arith.constant 0 : index
    %c0_18 = arith.constant 0 : index
    %23 = vector.load %arg8[%c0_17, %c0_18] : memref<16x16xf32, #tpu.memory_space<vmem>>, vector<16x16xf32>
    tpu.vector_store %arg8[%c0_17, %c0_18], %22 {strides = array<i32>} : memref<16x16xf32, #tpu.memory_space<vmem>>, vector<16x16xf32>,
    return
  }
  func.func @transform_0(%arg0: i32) -> (i32, i32) {
    %c0_i32 = arith.constant 0 : i32
    %c0_i32_0 = arith.constant 0 : i32
    return %arg0, %c0_i32 : i32, i32
  }
  func.func @transform_1(%arg0: i32) -> (i32, i32) {
    %c0_i32 = arith.constant 0 : i32
    %c0_i32_0 = arith.constant 0 : i32
    %c0_i32_1 = arith.constant 0 : i32
    return %c0_i32, %c0_i32_0 : i32, i32
  }
  func.func @transform_2(%arg0: i32) -> (i32, i32) {
    %c0_i32 = arith.constant 0 : i32
    %c0_i32_0 = arith.constant 0 : i32
    %c0_i32_1 = arith.constant 0 : i32
    return %c0_i32, %c0_i32_0 : i32, i32
  }
  func.func @transform_3(%arg0: i32) -> (i32, i32) {
    %c0_i32 = arith.constant 0 : i32
    %c0_i32_0 = arith.constant 0 : i32
    %c0_i32_1 = arith.constant 0 : i32
    return %c0_i32, %c0_i32_0 : i32, i32
  }
  func.func @transform_4(%arg0: i32) -> (i32, i32) {
    %c0_i32 = arith.constant 0 : i32
    %c0_i32_0 = arith.constant 0 : i32
    %c0_i32_1 = arith.constant 0 : i32
    return %c0_i32, %c0_i32_0 : i32, i32
  }
  func.func @transform_5(%arg0: i32) -> (i32, i32) {
    %c0_i32 = arith.constant 0 : i32
    %c0_i32_0 = arith.constant 0 : i32
    %c0_i32_1 = arith.constant 0 : i32
    return %c0_i32, %c0_i32_0 : i32, i32
  }
  func.func @transform_6(%arg0: i32) -> (i32, i32) {
    %c0_i32 = arith.constant 0 : i32
    %c0_i32_0 = arith.constant 0 : i32
    %c0_i32_1 = arith.constant 0 : i32
    return %c0_i32, %c0_i32_0 : i32, i32
  }
  func.func @transform_7(%arg0: i32) -> (i32, i32) {
    %c0_i32 = arith.constant 0 : i32
    %c0_i32_0 = arith.constant 0 : i32
    return %arg0, %c0_i32 : i32, i32
  }
}

</mosaic_0001>

<bundles_post_ra>
// kernel: simple_context_mlp.1
= control target key start
LH: loop header
LB: loop body
LE: loop exit
PB: predicated region body
PF: predicated region fallthrough
CT: control target
= control target key end

     0   :  { %v446_v0 = vmov 0.0   ;;  %vm447_vm0 = vmmov 0   ;;  %vm53_vm1 = vcmask 261120   ;;  %vm328_vm2 = vcmask 130048   ;;  %s587_s1 = inlined_call_operand.vmem [shape: bf16[32,128], index: 1, kind: input, shape index: {}]   ;;  %s588_s0 = inlined_call_operand.vmem [shape: f32[16,32], index: 0, kind: input, shape index: {}]   ;;  %s589_s3 = inlined_call_operand.vmem [shape: bf16[128,128], index: 3, kind: input, shape index: {}]   ;;  %s590_s5 = inlined_call_operand.vmem [shape: bf16[128,16], index: 5, kind: input, shape index: {}]   ;;  %s591_s2 = inlined_call_operand.vmem [shape: f32[1,128], index: 2, kind: input, shape index: {}]   ;;  %s592_s4 = inlined_call_operand.vmem [shape: f32[1,128], index: 4, kind: input, shape index: {}]   ;;  %s593_s6 = inlined_call_operand.vmem [shape: f32[1,16], index: 6, kind: input, shape index: {}]   ;;  %s594_s7 = inlined_call_operand.vmem [shape: f32[16,16], index: 7, kind: output, shape index: {}]  }
   0x1   :  { %378 = vmatprep.subr.bf16.mxu0 %v446_v0  ;;  %v428_v1 = vld [vmem:[%s587_s1 + $0x8] sm:$0xff]   ;;  %382 = vmatprep.mubr.msk.bf16.mxu0 %vm447_vm0, %v446_v0  ;;  %v429_v2 = vld [vmem:[%s587_s1] sm:$0xff]   ;;  %v430_v5 = vld [vmem:[%s589_s3 + $0x38] sm:$0xff]  }
   0x2   :  { %386 = vmatprep.subr.bf16.mxu1 %v446_v0  ;;  %402 = vmatprep.mubr.msk.bf16.mxu1 %vm447_vm0, %v446_v0  ;;  %v27_v3 = vld [vmem:[%s588_s0] sm:$0xff]  ;;  %v28_v4 = vld [vmem:[%s588_s0 + $0x8] sm:$0xff]  ;;  %v431_v7 = vld [vmem:[%s589_s3 + $0x30] sm:$0xff]  }
   0x3   :  { %379 = vmatpush3.bf16.msra.mxu0 %v428_v1  ;;  %v29_v6 = vpack.c.bf16 %v28_v4, %v27_v3  ;;  %387 = vmatpush3.bf16.msra.mxu1 %v430_v5  ;;  %v432_v8 = vld [vmem:[%s589_s3 + $0x28] sm:$0xff]   ;;  %v433_v9 = vld [vmem:[%s589_s3 + $0x20] sm:$0xff]   ;;  %v434_v10 = vld [vmem:[%s589_s3 + $0x18] sm:$0xff]  }
   0x4   :  { %380 = vmatprep.subr.bf16.mxu0 %v446_v0  ;;  %388 = vmatprep.subr.bf16.mxu1 %v446_v0  ;;  %v435_v11 = vld [vmem:[%s589_s3 + $0x10] sm:$0xff]   ;;  %v436_v12 = vld [vmem:[%s589_s3 + $0x8] sm:$0xff]   ;;  %v437_v13 = vld [vmem:[%s589_s3] sm:$0xff]  }
   0x5   :  { %v438_v14 = vld [vmem:[%s590_s5 + $0x38] sm:$0xff]   ;;  %v439_v15 = vld [vmem:[%s590_s5 + $0x30] sm:$0xff]   ;;  %v440_v16 = vld [vmem:[%s590_s5 + $0x28] sm:$0xff]  }
   0x6   :  { %v441_v17 = vld [vmem:[%s590_s5 + $0x20] sm:$0xff]   ;;  %v442_v18 = vld [vmem:[%s590_s5 + $0x18] sm:$0xff]   ;;  %v443_v29 = vld [vmem:[%s590_s5 + $0x10] sm:$0xff]  }
   0x7   :  { %381 = vmatpush3.bf16.msra.mxu0 %v429_v2  ;;  %389 = vmatpush3.bf16.msra.mxu1 %v431_v7  ;;  %v335_v19 = vld [vmem:[%s591_s2] ss:$0 sm:$0xff]  ;;  %v444_v30 = vld [vmem:[%s590_s5 + $0x8] sm:$0xff]  }
   0x8   :  { %406 = vmatprep.subr.bf16.mxu0 %v446_v0  ;;  %390 = vmatprep.subr.bf16.mxu1 %v446_v0  ;;  %v445_v31 = vld [vmem:[%s590_s5] sm:$0xff]  }
   0x9   :  { %v339_v32 = vld [vmem:[%s592_s4] ss:$0 sm:$0xff] }
   0xa   :  { %383 = vmatmul.mubr.msk.bf16.vlgmr.msra.gmra.mxu0 %vm53_vm1, %v29_v6  ;;  %v348_v42 = vld [vmem:[%s593_s6] ss:$0 sm:$0xff] }
   0xb   :  { %422 = vmatprep.mubr.msk.bf16.mxu0 %vm447_vm0, %v446_v0  ;;  %391 = vmatpush3.bf16.msra.mxu1 %v432_v8 }
   0xc   :  { %392 = vmatprep.subr.bf16.mxu1 %v446_v0  ;;  %407 = vmatpush3.bf16.msra.mxu0 %v438_v14 }
   0xd   :  { %408 = vmatprep.subr.bf16.mxu0 %v446_v0 }
   0xf   :  { %393 = vmatpush3.bf16.msra.mxu1 %v433_v9 }
  0x10   :  { %394 = vmatprep.subr.bf16.mxu1 %v446_v0  ;;  %409 = vmatpush3.bf16.msra.mxu0 %v439_v15 }
  0x11   :  { %410 = vmatprep.subr.bf16.mxu0 %v446_v0 }
  0x13   :  { %395 = vmatpush3.bf16.msra.mxu1 %v434_v10 }
  0x14   :  { %396 = vmatprep.subr.bf16.mxu1 %v446_v0  ;;  %411 = vmatpush3.bf16.msra.mxu0 %v440_v16 }
  0x15   :  { %412 = vmatprep.subr.bf16.mxu0 %v446_v0 }
  0x17   :  { %397 = vmatpush3.bf16.msra.mxu1 %v435_v11 }
  0x18   :  { %398 = vmatprep.subr.bf16.mxu1 %v446_v0  ;;  %413 = vmatpush3.bf16.msra.mxu0 %v441_v17 }
  0x19   :  { %414 = vmatprep.subr.bf16.mxu0 %v446_v0 }
  0x1b   :  { %399 = vmatpush3.bf16.msra.mxu1 %v436_v12 }
  0x1c   :  { %400 = vmatprep.subr.bf16.mxu1 %v446_v0  ;;  %415 = vmatpush3.bf16.msra.mxu0 %v442_v18 }
  0x1d   :  { %416 = vmatprep.subr.bf16.mxu0 %v446_v0 }
  0x1f   :  { %401 = vmatpush3.bf16.msra.mxu1 %v437_v13 }
  0x20   :  { %417 = vmatpush3.bf16.msra.mxu0 %v443_v29 }
  0x21   :  { %418 = vmatprep.subr.bf16.mxu0 %v446_v0 }
  0x24   :  { %419 = vmatpush3.bf16.msra.mxu0 %v444_v30 }
  0x25   :  { %420 = vmatprep.subr.bf16.mxu0 %v446_v0 }
  0x28   :  { %421 = vmatpush3.bf16.msra.mxu0 %v445_v31 }
  0xca   :  { %v91_v20 = vpop.f32.mrf.mxu0 }
  0xcb   :  { %v92_v22 = vadd.f32 %v335_v19, %v91_v20 }
  0xcc   :  { %v384_v21 = vpop.f32.mrf.mxu0 }
  0xcd   :  { %v98_v26 = vmax.f32 %v92_v22, 0.0 }
  0xce   :  { %v94_v23 = vpop.f32.mrf.mxu0 }
  0xcf   :  { %v95_v24 = vadd.f32 %v335_v19, %v94_v23 }
  0xd0   :  { %v385_v25 = vpop.f32.mrf.mxu0 }
  0xd1   :  { %v99_v27 = vmax.f32 %v95_v24, 0.0 }
  0xd3   :  { %v100_v28 = vpack.c.bf16 %v99_v27, %v98_v26 }
  0xd5   :  { %403 = vmatmul.mubr.bf16.vlgmr.msra.gmra.mxu1 %v100_v28 }
 0x195   :  { %v206_v33 = vpop.f32.mrf.mxu1 }
 0x196   :  { %v207_v35 = vadd.f32 %v339_v32, %v206_v33 }
 0x197   :  { %v404_v34 = vpop.f32.mrf.mxu1 }
 0x198   :  { %v213_v39 = vmax.f32 %v207_v35, 0.0 }
 0x199   :  { %v209_v36 = vpop.f32.mrf.mxu1 }
 0x19a   :  { %v210_v37 = vadd.f32 %v339_v32, %v209_v36 }
 0x19b   :  { %v405_v38 = vpop.f32.mrf.mxu1 }
 0x19c   :  { %v214_v40 = vmax.f32 %v210_v37, 0.0 }
 0x19e   :  { %v215_v41 = vpack.c.bf16 %v214_v40, %v213_v39 }
 0x1a0   :  { %423 = vmatmul.mubr.bf16.vlgmr.msra.gmra.mxu0 %v215_v41 }
 0x260   :  { %v321_v43 = vpop.f32.mrf.mxu0 }
 0x261   :  { %v322_v44 = vadd.f32 %v348_v42, %v321_v43 }
 0x262   :  { %v424_v45 = vpop.f32.mrf.mxu0 }
 0x263   :  { %329 = vst.msk [vmem:[%s594_s7] sm:$0xff] %vm328_vm2, %v322_v44 }
 0x264   :  { %v324_v46 = vpop.f32.mrf.mxu0 }
 0x265   :  { %v325_v47 = vadd.f32 %v348_v42, %v324_v46 }
 0x266   :  { %v425_v48 = vpop.f32.mrf.mxu0 }
 0x267   :  { %330 = vst.msk [vmem:[%s594_s7 + $0x8] sm:$0xff] %vm328_vm2, %v325_v47 }

</bundles_post_ra>
